<compile_context>
chip_gen: v6e
topology: v6e:2x2x1
jax: 0.10.0
libtpu: 0.0.40
codegen_flags: <defaults>
</compile_context>

<pallas_src>
import functools

import jax
import jax.numpy as jnp
from jax.experimental import pallas as pl
from jax.experimental.pallas import tpu as pltpu


def _round_up(x, m):
    return ((x + m - 1) // m) * m


def _decoder_kernel(x_ref, w1_ref, b1_ref, w2_ref, b2_ref, w3_ref, b3_ref,
                    o_ref):
    cd = w1_ref.dtype
    # In-kernel cast of the f32 x tile (VPU work hidden under DMA / MXU).
    x = x_ref[...].astype(cd)
    # Layer 1: Linear(E, 64 -> padded 128) + ReLU   (f32 accumulate)
    h1 = jnp.dot(x, w1_ref[...], preferred_element_type=jnp.float32) + b1_ref[...]
    h1 = jnp.maximum(h1, 0.0)
    # Layer 2: Linear(128, 128) + ReLU
    h2 = jnp.dot(h1.astype(cd), w2_ref[...],
                 preferred_element_type=jnp.float32) + b2_ref[...]
    h2 = jnp.maximum(h2, 0.0)
    # Layer 3: Linear(128, O_tile) + Sigmoid
    z = jnp.dot(h2.astype(cd), w3_ref[...],
                preferred_element_type=jnp.float32) + b3_ref[...]
    o_ref[...] = jax.nn.sigmoid(z).astype(o_ref.dtype)


def _vmem_cap_bytes():
    """Per-generation usable VMEM cap (physical minus headroom)."""
    try:
        physical = int(pltpu.get_tpu_info().vmem_capacity_bytes)
    except Exception:
        physical = 64 << 20  # conservative fallback (v7x per-TC physical)
    return max(min(physical - (8 << 20), 100 << 20), 32 << 20)


def _fit_tiles(tile_b, e, o_pad, cap, w_isz, out_isz):
    """Shrink (TILE_N, then TILE_B) until the tile footprint fits the cap."""

    def need(tb, tn):
        x_buf = 2 * tb * e * 4                                  # f32 x, 2-buf
        out_buf = 2 * tb * tn * out_isz                         # out tile, 2-buf
        res = 2 * ((e * 128 + 128 * 128) * w_isz + 2 * 128 * 4)  # resident w1,w2,b1,b2
        w3_buf = 2 * (128 * tn * w_isz + tn * 4)                # pipelined w3/b3
        act = tb * (128 + 128 + tn) * 4                         # live f32 intermediates
        return x_buf + out_buf + res + w3_buf + act + (4 << 20)  # headroom

    tn = o_pad
    while tn > 128 and need(tile_b, tn) > cap:
        tn = max(128, ((tn // 2) // 128) * 128)
    while tile_b > 8 and need(tile_b, tn) > cap:
        tile_b = max(8, ((tile_b // 2) // 8) * 8)
    return tile_b, tn, need(tile_b, tn)


@functools.partial(
    jax.jit,
    static_argnames=("compute_dtype", "out_dtype", "max_tile_b",
                     "use_core_parallel"))
def linear_decoder(x, params, *, compute_dtype=jnp.bfloat16,
                   out_dtype=jnp.float32, max_tile_b=512,
                   use_core_parallel=False):
    """x: (B, E) float32. params: w1,b1,w2,b2,w3,b3 with weights as (in, out)."""
    w1, b1 = params["w1"], params["b1"]
    w2, b2 = params["w2"], params["b2"]
    w3, b3 = params["w3"], params["b3"]

    B, E = x.shape
    O = w3.shape[1]

    # --- batch tiling: multiple of 8 sublanes, VMEM-budget-derived cap ------
    TILE_B = min(max_tile_b, _round_up(B, 8))
    if B > TILE_B and B % TILE_B != 0:
        # Prefer a tile that divides B so no batch padding / post-slice needed.
        for t in range(TILE_B, TILE_B // 2 - 1, -8):
            if B % t == 0:
                TILE_B = t
                break

    # --- output tiling: lane-dense (multiple of 128), fit to VMEM cap -------
    O_pad = _round_up(O, 128)
    cap = _vmem_cap_bytes()
    w_isz = jnp.dtype(compute_dtype).itemsize
    out_isz = jnp.dtype(out_dtype).itemsize
    TILE_B, TILE_N, vmem_need = _fit_tiles(TILE_B, E, O_pad, cap, w_isz, out_isz)
    O_pad = _round_up(O_pad, TILE_N)
    B_pad = pl.cdiv(B, TILE_B) * TILE_B

    # --- weight prep (trace-time): layer-1 width 64 -> 128, w3/b3 -> O_pad --
    H1 = 128
    w1 = jnp.pad(w1, ((0, 0), (0, H1 - w1.shape[1])))
    b1 = jnp.pad(b1, (0, H1 - b1.shape[0]))
    w2 = jnp.pad(w2, ((0, H1 - w2.shape[0]), (0, 0)))
    if O_pad != O:
        w3 = jnp.pad(w3, ((0, 0), (0, O_pad - O)))
        b3 = jnp.pad(b3, (0, O_pad - O))
    if B_pad != B:
        x = jnp.pad(x, ((0, B_pad - B), (0, 0)))

    # MXU operands in compute_dtype (bf16 default on all gens); biases f32.
    w1c, w2c, w3c = (w.astype(compute_dtype) for w in (w1, w2, w3))
    b1r, b2r, b3r = (b.reshape(1, -1).astype(jnp.float32)
                     for b in (b1, b2, b3))

    grid = (B_pad // TILE_B, O_pad // TILE_N)
    resident = lambda shape: pl.BlockSpec(shape, lambda i, j: (0, 0))

    flops = 2 * B_pad * (E * 128 + 128 * 128 + 128 * O_pad)
    bytes_accessed = (B_pad * E * 4 + B_pad * O_pad * out_isz
                      + (E * 128 + 128 * 128 + 128 * O_pad) * w_isz
                      + (128 + 128 + O_pad) * 4)

    # TODO(synk): set use_core_parallel=True on v7x (2 TCs/chip) once the
    # batch grid has >= 2 steps; plain "parallel" is a no-op on v5e/v6e.
    batch_sem = pltpu.CORE_PARALLEL if use_core_parallel else "parallel"

    out = pl.pallas_call(
        _decoder_kernel,
        out_shape=jax.ShapeDtypeStruct((B_pad, O_pad), out_dtype),
        grid=grid,
        in_specs=[
            pl.BlockSpec((TILE_B, E), lambda i, j: (i, 0)),   # f32 x tile (reused over j)
            resident(w1c.shape), resident(b1r.shape),          # resident layer 1-2
            resident(w2c.shape), resident(b2r.shape),
            pl.BlockSpec((H1, TILE_N), lambda i, j: (0, j)),  # pipelined w3 column block
            pl.BlockSpec((1, TILE_N), lambda i, j: (0, j)),   # pipelined b3 block
        ],
        out_specs=pl.BlockSpec((TILE_B, TILE_N), lambda i, j: (i, j)),
        compiler_params=pltpu.CompilerParams(
            dimension_semantics=(batch_sem, "parallel"),
            vmem_limit_bytes=int(min(cap, max(vmem_need, 16 << 20))),
        ),
        cost_estimate=pl.CostEstimate(
            flops=flops,
            transcendentals=2 * B_pad * O_pad,
            bytes_accessed=bytes_accessed,
        ),
    )(x, w1c, b1r, w2c, b2r, w3c, b3r)

    # Slice off only the dims that were actually padded (avoid a no-op copy).
    if B_pad != B and O_pad != O:
        out = out[:B, :O]
    elif B_pad != B:
        out = out[:B]
    elif O_pad != O:
        out = out[:, :O]
    return out


def init_params(key, encoding_dim, output_dim):
    """Deterministic init mimicking nn.Linear's U(-1/sqrt(fan_in), 1/sqrt(fan_in))."""
    dims = [(encoding_dim, 64), (64, 128), (128, output_dim)]
    params = {}
    for i, (fan_in, fan_out) in enumerate(dims, start=1):
        key, kw, kb = jax.random.split(key, 3)
        bound = 1.0 / jnp.sqrt(float(fan_in))
        params[f"w{i}"] = jax.random.uniform(
            kw, (fan_in, fan_out), jnp.float32, -bound, bound)
        params[f"b{i}"] = jax.random.uniform(
            kb, (fan_out,), jnp.float32, -bound, bound)
    return params


def _reference(x, params, compute_dtype=jnp.float32):
    """Pure-JAX reference matching the kernel's cast/accumulate placement."""
    w1 = params["w1"].astype(compute_dtype)
    w2 = params["w2"].astype(compute_dtype)
    w3 = params["w3"].astype(compute_dtype)
    h1 = jnp.dot(x.astype(compute_dtype), w1,
                 preferred_element_type=jnp.float32) + params["b1"]
    h1 = jnp.maximum(h1, 0.0)
    h2 = jnp.dot(h1.astype(compute_dtype), w2,
                 preferred_element_type=jnp.float32) + params["b2"]
    h2 = jnp.maximum(h2, 0.0)
    z = jnp.dot(h2.astype(compute_dtype), w3,
                preferred_element_type=jnp.float32) + params["b3"]
    return jax.nn.sigmoid(z)


if __name__ == "__main__":
    key = jax.random.PRNGKey(0)

    # --- config 1: aligned shapes (no padding path) -------------------------
    encoding_dim, output_dim, batch = 32, 256, 8
    key, kx = jax.random.split(key)
    x = jax.random.normal(kx, (batch, encoding_dim), jnp.float32)
    params = init_params(key, encoding_dim, output_dim)

    # Default path: bf16 operands / f32 accumulate, f32 output.
    out_bf16 = jax.block_until_ready(linear_decoder(x, params))
    ref_bf16 = _reference(x, params, compute_dtype=jnp.bfloat16)
    assert out_bf16.shape == (batch, output_dim)
    assert out_bf16.dtype == jnp.float32
    assert jnp.allclose(out_bf16, ref_bf16, atol=2e-2, rtol=2e-2)

    # f32-operand path, tight tolerance against the f32 reference.
    out_f32 = jax.block_until_ready(
        linear_decoder(x, params, compute_dtype=jnp.float32))
    ref_f32 = _reference(x, params)
    assert jnp.allclose(out_f32, ref_f32, atol=1e-5, rtol=1e-5)

    # --- config 2: unaligned batch / output dim (exercise padding + slice) --
    encoding_dim2, output_dim2, batch2 = 32, 200, 13
    key, kx2 = jax.random.split(key)
    x2 = jax.random.normal(kx2, (batch2, encoding_dim2), jnp.float32)
    params2 = init_params(key, encoding_dim2, output_dim2)
    out2 = jax.block_until_ready(
        linear_decoder(x2, params2, compute_dtype=jnp.float32))
    ref2 = _reference(x2, params2)
    assert out2.shape == (batch2, output_dim2)
    assert jnp.allclose(out2, ref2, atol=1e-5, rtol=1e-5)

    print("KERNEL_OK")
</pallas_src>

<mosaic_0001>
module attributes {stable_mosaic.version = 11 : i64} {
  func.func @_decoder_kernel(%arg0: i32, %arg1: i32, %arg2: memref<8x32xf32, #tpu.memory_space<vmem>>, %arg3: memref<32x128xbf16, #tpu.memory_space<vmem>>, %arg4: memref<1x128xf32, #tpu.memory_space<vmem>>, %arg5: memref<128x128xbf16, #tpu.memory_space<vmem>>, %arg6: memref<1x128xf32, #tpu.memory_space<vmem>>, %arg7: memref<128x256xbf16, #tpu.memory_space<vmem>>, %arg8: memref<1x256xf32, #tpu.memory_space<vmem>>, %arg9: memref<8x256xf32, #tpu.memory_space<vmem>>) attributes {dimension_semantics = [#tpu.dimension_semantics<parallel>, #tpu.dimension_semantics<parallel>], iteration_bounds = array<i64: 1, 1>, scalar_prefetch = 0 : i64, scratch_operands = 0 : i64, tpu.core_type = #tpu.core_type<tc>, window_params = [{transform_indices = @transform_0, window_bounds = array<i64: 8, 32>}, {pipeline_mode = #tpu.pipeline_mode<synchronous>, transform_indices = @transform_1, window_bounds = array<i64: 32, 128>}, {pipeline_mode = #tpu.pipeline_mode<synchronous>, transform_indices = @transform_2, window_bounds = array<i64: 1, 128>}, {pipeline_mode = #tpu.pipeline_mode<synchronous>, transform_indices = @transform_3, window_bounds = array<i64: 128, 128>}, {pipeline_mode = #tpu.pipeline_mode<synchronous>, transform_indices = @transform_4, window_bounds = array<i64: 1, 128>}, {transform_indices = @transform_5, window_bounds = array<i64: 128, 256>}, {transform_indices = @transform_6, window_bounds = array<i64: 1, 256>}, {transform_indices = @transform_7, window_bounds = array<i64: 8, 256>}]} {
    %c0 = arith.constant 0 : index
    %c0_0 = arith.constant 0 : index
    %0 = vector.load %arg2[%c0, %c0_0] : memref<8x32xf32, #tpu.memory_space<vmem>>, vector<8x32xf32>
    %1 = arith.truncf %0 : vector<8x32xf32> to vector<8x32xbf16>
    %c0_1 = arith.constant 0 : index
    %c0_2 = arith.constant 0 : index
    %2 = vector.load %arg3[%c0_1, %c0_2] : memref<32x128xbf16, #tpu.memory_space<vmem>>, vector<32x128xbf16>
    %cst = arith.constant dense<0.000000e+00> : vector<8x128xf32>
    %3 = tpu.matmul %1, %2, %cst {dimension_numbers = #tpu.dot_dimension_numbers<[1], [0], [0], [1], [0, 0, 1, 1], [], []>} : vector<8x32xbf16>, vector<32x128xbf16>, vector<8x128xf32> -> vector<8x128xf32>
    %c0_3 = arith.constant 0 : index
    %c0_4 = arith.constant 0 : index
    %4 = vector.load %arg4[%c0_3, %c0_4] : memref<1x128xf32, #tpu.memory_space<vmem>>, vector<1x128xf32>
    %5 = vector.broadcast %4 : vector<1x128xf32> to vector<8x128xf32>
    %6 = arith.addf %3, %5 : vector<8x128xf32>
    %cst_5 = arith.constant 0.000000e+00 : f32
    %7 = vector.broadcast %cst_5 : f32 to vector<8x128xf32>
    %8 = arith.maximumf %6, %7 : vector<8x128xf32>
    %9 = arith.truncf %8 : vector<8x128xf32> to vector<8x128xbf16>
    %c0_6 = arith.constant 0 : index
    %c0_7 = arith.constant 0 : index
    %10 = vector.load %arg5[%c0_6, %c0_7] : memref<128x128xbf16, #tpu.memory_space<vmem>>, vector<128x128xbf16>
    %cst_8 = arith.constant dense<0.000000e+00> : vector<8x128xf32>
    %11 = tpu.matmul %9, %10, %cst_8 {dimension_numbers = #tpu.dot_dimension_numbers<[1], [0], [0], [1], [0, 0, 1, 1], [], []>} : vector<8x128xbf16>, vector<128x128xbf16>, vector<8x128xf32> -> vector<8x128xf32>
    %c0_9 = arith.constant 0 : index
    %c0_10 = arith.constant 0 : index
    %12 = vector.load %arg6[%c0_9, %c0_10] : memref<1x128xf32, #tpu.memory_space<vmem>>, vector<1x128xf32>
    %13 = vector.broadcast %12 : vector<1x128xf32> to vector<8x128xf32>
    %14 = arith.addf %11, %13 : vector<8x128xf32>
    %cst_11 = arith.constant 0.000000e+00 : f32
    %15 = vector.broadcast %cst_11 : f32 to vector<8x128xf32>
    %16 = arith.maximumf %14, %15 : vector<8x128xf32>
    %17 = arith.truncf %16 : vector<8x128xf32> to vector<8x128xbf16>
    %c0_12 = arith.constant 0 : index
    %c0_13 = arith.constant 0 : index
    %18 = vector.load %arg7[%c0_12, %c0_13] : memref<128x256xbf16, #tpu.memory_space<vmem>>, vector<128x256xbf16>
    %cst_14 = arith.constant dense<0.000000e+00> : vector<8x256xf32>
    %19 = tpu.matmul %17, %18, %cst_14 {dimension_numbers = #tpu.dot_dimension_numbers<[1], [0], [0], [1], [0, 0, 1, 1], [], []>} : vector<8x128xbf16>, vector<128x256xbf16>, vector<8x256xf32> -> vector<8x256xf32>
    %c0_15 = arith.constant 0 : index
    %c0_16 = arith.constant 0 : index
    %20 = vector.load %arg8[%c0_15, %c0_16] : memref<1x256xf32, #tpu.memory_space<vmem>>, vector<1x256xf32>
    %21 = vector.broadcast %20 : vector<1x256xf32> to vector<8x256xf32>
    %22 = arith.addf %19, %21 : vector<8x256xf32>
    %23 = arith.negf %22 : vector<8x256xf32>
    %24 = math.exp %23 : vector<8x256xf32>
    %cst_17 = arith.constant 1.000000e+00 : f32
    %25 = vector.broadcast %cst_17 : f32 to vector<8x256xf32>
    %26 = arith.addf %25, %24 : vector<8x256xf32>
    %27 = arith.divf %25, %26 : vector<8x256xf32>
    %c0_18 = arith.constant 0 : index
    %c0_19 = arith.constant 0 : index
    %28 = vector.load %arg9[%c0_18, %c0_19] : memref<8x256xf32, #tpu.memory_space<vmem>>, vector<8x256xf32>
    tpu.vector_store %arg9[%c0_18, %c0_19], %27 {strides = array<i32>} : memref<8x256xf32, #tpu.memory_space<vmem>>, vector<8x256xf32>,
    return
  }
  func.func @transform_0(%arg0: i32, %arg1: i32) -> (i32, i32) {
    %c0_i32 = arith.constant 0 : i32
    %c0_i32_0 = arith.constant 0 : i32
    return %arg0, %c0_i32 : i32, i32
  }
  func.func @transform_1(%arg0: i32, %arg1: i32) -> (i32, i32) {
    %c0_i32 = arith.constant 0 : i32
    %c0_i32_0 = arith.constant 0 : i32
    %c0_i32_1 = arith.constant 0 : i32
    return %c0_i32, %c0_i32_0 : i32, i32
  }
  func.func @transform_2(%arg0: i32, %arg1: i32) -> (i32, i32) {
    %c0_i32 = arith.constant 0 : i32
    %c0_i32_0 = arith.constant 0 : i32
    %c0_i32_1 = arith.constant 0 : i32
    return %c0_i32, %c0_i32_0 : i32, i32
  }
  func.func @transform_3(%arg0: i32, %arg1: i32) -> (i32, i32) {
    %c0_i32 = arith.constant 0 : i32
    %c0_i32_0 = arith.constant 0 : i32
    %c0_i32_1 = arith.constant 0 : i32
    return %c0_i32, %c0_i32_0 : i32, i32
  }
  func.func @transform_4(%arg0: i32, %arg1: i32) -> (i32, i32) {
    %c0_i32 = arith.constant 0 : i32
    %c0_i32_0 = arith.constant 0 : i32
    %c0_i32_1 = arith.constant 0 : i32
    return %c0_i32, %c0_i32_0 : i32, i32
  }
  func.func @transform_5(%arg0: i32, %arg1: i32) -> (i32, i32) {
    %c0_i32 = arith.constant 0 : i32
    %c0_i32_0 = arith.constant 0 : i32
    return %c0_i32, %arg1 : i32, i32
  }
  func.func @transform_6(%arg0: i32, %arg1: i32) -> (i32, i32) {
    %c0_i32 = arith.constant 0 : i32
    %c0_i32_0 = arith.constant 0 : i32
    return %c0_i32, %arg1 : i32, i32
  }
  func.func @transform_7(%arg0: i32, %arg1: i32) -> (i32, i32) {
    %c0_i32 = arith.constant 0 : i32
    return %arg0, %arg1 : i32, i32
  }
}

</mosaic_0001>

<bundles_post_ra>
// kernel: linear_decoder.1
= control target key start
LH: loop header
LB: loop body
LE: loop exit
PB: predicated region body
PF: predicated region fallthrough
CT: control target
= control target key end

     0   :  { %v528_v1 = vmov 0.0   ;;  %vm529_vm0 = vmmov 0   ;;  %vm53_vm1 = vcmask 261120   ;;  %s665_s0 = inlined_call_operand.vmem [shape: f32[8,32], index: 0, kind: input, shape index: {}]   ;;  %s666_s1 = inlined_call_operand.vmem [shape: bf16[32,128], index: 1, kind: input, shape index: {}]   ;;  %s667_s2 = inlined_call_operand.vmem [shape: f32[1,128], index: 2, kind: input, shape index: {}]   ;;  %s668_s3 = inlined_call_operand.vmem [shape: bf16[128,128], index: 3, kind: input, shape index: {}]   ;;  %s669_s4 = inlined_call_operand.vmem [shape: f32[1,128], index: 4, kind: input, shape index: {}]   ;;  %s670_s5 = inlined_call_operand.vmem [shape: bf16[128,256], index: 5, kind: input, shape index: {}]   ;;  %s671_s6 = inlined_call_operand.vmem [shape: f32[1,256], index: 6, kind: input, shape index: {}]   ;;  %s672_s7 = inlined_call_operand.hbm [shape: f32[8,256], index: 7, kind: output, shape index: {}]  }
   0x1   :  { %v464_v0 = vld [vmem:[%s666_s1 + $0x8] sm:$0xff]   ;;  %432 = vmatprep.subr.bf16.mxu0 %v528_v1  ;;  %v465_v2 = vld [vmem:[%s666_s1] sm:$0xff]   ;;  %440 = vmatprep.subr.bf16.mxu1 %v528_v1  ;;  %v466_v4 = vld [vmem:[%s668_s3 + $0x38] sm:$0xff]  }
   0x2   :  { %433 = vmatpush3.bf16.msra.mxu0 %v464_v0  ;;  %436 = vmatprep.mubr.msk.bf16.mxu0 %vm529_vm0, %v528_v1  ;;  %v28_v3 = vld [vmem:[%s665_s0] sm:$0xff]  ;;  %v467_v6 = vld [vmem:[%s668_s3 + $0x30] sm:$0xff]   ;;  %v468_v7 = vld [vmem:[%s668_s3 + $0x28] sm:$0xff]  }
   0x3   :  { %434 = vmatprep.subr.bf16.mxu0 %v528_v1  ;;  %456 = vmatprep.mubr.msk.bf16.mxu1 %vm529_vm0, %v528_v1  ;;  %v29_v5 = vpack.c.bf16 %v28_v3, %v28_v3  ;;  %v469_v8 = vld [vmem:[%s668_s3 + $0x20] sm:$0xff]  }
   0x4   :  { %441 = vmatpush3.bf16.msra.mxu1 %v466_v4 }
   0x5   :  { %442 = vmatprep.subr.bf16.mxu1 %v528_v1 }
   0x6   :  { %435 = vmatpush3.bf16.msra.mxu0 %v465_v2 }
   0x8   :  { %443 = vmatpush3.bf16.msra.mxu1 %v467_v6 }
   0x9   :  { %437 = vmatmul.mubr.msk.bf16.vlgmr.msra.gmra.mxu0 %vm53_vm1, %v29_v5  ;;  %444 = vmatprep.subr.bf16.mxu1 %v528_v1 }
   0xc   :  { %445 = vmatpush3.bf16.msra.mxu1 %v468_v7 }
   0xd   :  { %446 = vmatprep.subr.bf16.mxu1 %v528_v1 }
   0xe   :  { %12 = vsyncpa [#allocation3], 0  ;;  %v470_v9 = vld [vmem:[%s668_s3 + $0x18] sm:$0xff]   ;;  %v471_v10 = vld [vmem:[%s668_s3 + $0x10] sm:$0xff]   ;;  %v530_v37 = vmov 0   ;;  %v230_v46 = vlaneseq }
   0xf   :  { %v472_v11 = vld [vmem:[%s668_s3 + $0x8] sm:$0xff]   ;;  %v473_v12 = vld [vmem:[%s668_s3] sm:$0xff]   ;;  %v474_v13 = vld [vmem:[%s670_s5 + $0x70] ss:$8 sps:$4 sm:$0xff]   ;;  %352 = vmatprep.mubr.bf16.mxu0 %v530_v37 }
  0x10   :  { %447 = vmatpush3.bf16.msra.mxu1 %v469_v8  ;;  %v476_v14 = vld [vmem:[%s670_s5 + $0x74] ss:$8 sps:$4 sm:$0xff]   ;;  %v479_v15 = vld [vmem:[%s670_s5 + $0x64] ss:$8 sps:$4 sm:$0xff]   ;;  %v477_v16 = vld [vmem:[%s670_s5 + $0x60] ss:$8 sps:$4 sm:$0xff]  }
  0x11   :  { %448 = vmatprep.subr.bf16.mxu1 %v528_v1  ;;  %320 = vmatprep.subr.bf16.mxu0 %v476_v14  ;;  %v482_v17 = vld [vmem:[%s670_s5 + $0x54] ss:$8 sps:$4 sm:$0xff]   ;;  %v480_v18 = vld [vmem:[%s670_s5 + $0x50] ss:$8 sps:$4 sm:$0xff]   ;;  %v485_v19 = vld [vmem:[%s670_s5 + $0x44] ss:$8 sps:$4 sm:$0xff]  }
  0x12   :  { %321 = vmatpush1.bf16.msra.mxu0 %v474_v13  ;;  %v483_v20 = vld [vmem:[%s670_s5 + $0x40] ss:$8 sps:$4 sm:$0xff]   ;;  %v488_v21 = vld [vmem:[%s670_s5 + $0x34] ss:$8 sps:$4 sm:$0xff]   ;;  %v486_v22 = vld [vmem:[%s670_s5 + $0x30] ss:$8 sps:$4 sm:$0xff]  }
  0x13   :  { %322 = vmatprep.subr.bf16.mxu0 %v479_v15  ;;  %v491_v23 = vld [vmem:[%s670_s5 + $0x24] ss:$8 sps:$4 sm:$0xff]   ;;  %v489_v24 = vld [vmem:[%s670_s5 + $0x20] ss:$8 sps:$4 sm:$0xff]   ;;  %v494_v25 = vld [vmem:[%s670_s5 + $0x14] ss:$8 sps:$4 sm:$0xff]  }
  0x14   :  { %449 = vmatpush3.bf16.msra.mxu1 %v470_v9  ;;  %v492_v26 = vld [vmem:[%s670_s5 + $0x10] ss:$8 sps:$4 sm:$0xff]   ;;  %v389_v27 = vld [vmem:[%s667_s2] ss:$0 sm:$0xff]  ;;  %v497_v35 = vld [vmem:[%s670_s5 + $0x4] ss:$8 sps:$4 sm:$0xff]  }
  0x15   :  { %450 = vmatprep.subr.bf16.mxu1 %v528_v1  ;;  %v495_v36 = vld [vmem:[%s670_s5] ss:$8 sps:$4 sm:$0xff]   ;;  %v231_v47 = vshrl.u32 %v230_v46, 7 }
  0x16   :  { %323 = vmatpush1.bf16.msra.mxu0 %v477_v16  ;;  %v393_v38 = vld [vmem:[%s669_s4] ss:$0 sm:$0xff]  ;;  %s531_s4 = smov [#allocation2]  }
  0x17   :  { %324 = vmatprep.subr.bf16.mxu0 %v482_v17  ;;  %v232_v48 = vsub.s32 0, %v231_v47  ;;  %v228_v49 = vld [vmem:[%s671_s6] sm:$0x3]  ;;  %v236_v50 = vsub.s32 1, %v231_v47  ;;  %s381_s6 = sshll.u32 %s531_s4, 4  ;;  %s382_s6 = int_to_ptr.vmem [resolvable:$true] %s381_s6 }
  0x18   :  { %451 = vmatpush3.bf16.msra.mxu1 %v471_v10  ;;  %s506_s30 = scalar_lea.vmem %s382_s6, 256  ;;  %p511_p1 = scmp.lt.s32.totalorder %s382_s6, %s382_s6 }
  0x19   :  { %452 = vmatprep.subr.bf16.mxu1 %v528_v1  ;;  %v233_v51 = vrot.slane %v228_v49, %v232_v48  ;;  %v237_v52 = vrot.slane %v228_v49, %v236_v50  ;;  %p507_p0 = scmp.ne.s32.totalorder %s382_s6, %s506_s30  ;;  %p512_p2 = scmp.lt.s32.totalorder %s506_s30, %s506_s30 }
  0x1a   :  { %325 = vmatpush1.bf16.msra.mxu0 %v480_v18 }
  0x1b   :  { %326 = vmatprep.subr.bf16.mxu0 %v485_v19  ;;  %p513_p3 = por %p512_p2, %p511_p1 }
  0x1c   :  { %453 = vmatpush3.bf16.msra.mxu1 %v472_v11 }
  0x1d   :  { %454 = vmatprep.subr.bf16.mxu1 %v528_v1  ;;  %p514_p4 = pnand %p513_p3, %p507_p0 }
  0x1e   :  { %327 = vmatpush1.bf16.msra.mxu0 %v483_v20 }
  0x1f   :  { %328 = vmatprep.subr.bf16.mxu0 %v488_v21 }
  0x20   :  { %455 = vmatpush3.bf16.msra.mxu1 %v473_v12 }
  0x22   :  { %329 = vmatpush1.bf16.msra.mxu0 %v486_v22 }
  0x23   :  { %330 = vmatprep.subr.bf16.mxu0 %v491_v23 }
  0x26   :  { %331 = vmatpush1.bf16.msra.mxu0 %v489_v24 }
  0x27   :  { %332 = vmatprep.subr.bf16.mxu0 %v494_v25 }
  0x2a   :  { %333 = vmatpush1.bf16.msra.mxu0 %v492_v26 }
  0x2b   :  { %334 = vmatprep.subr.bf16.mxu0 %v497_v35 }
  0x2e   :  { %335 = vmatpush1.bf16.msra.mxu0 %v495_v36 }
  0xc9   :  { %v91_v28 = vpop.f32.mrf.mxu0 }
  0xca   :  { %v92_v29 = vadd.f32 %v389_v27, %v91_v28 }
  0xcb   :  { %v438_v30 = vpop.f32.mrf.mxu0 }
  0xcc   :  { %v97_v31 = vmax.f32 %v92_v29, 0.0 }
  0xcd   :  { %v94_v32 = vpop.f32.mrf.mxu0 }
  0xce   :  { %v98_v33 = vpack.c.bf16 %v97_v31, %v97_v31 }
  0xcf   :  { %v439_v34 = vpop.f32.mrf.mxu0 }
  0xd0   :  { %457 = vmatmul.mubr.bf16.vlgmr.msra.gmra.mxu1 %v98_v33 }
 0x190   :  { %v204_v39 = vpop.f32.mrf.mxu1 }
 0x191   :  { %v205_v40 = vadd.f32 %v393_v38, %v204_v39 }
 0x192   :  { %v458_v41 = vpop.f32.mrf.mxu1 }
 0x193   :  { %v210_v42 = vmax.f32 %v205_v40, 0.0 }
 0x194   :  { %v207_v43 = vpop.f32.mrf.mxu1 }
 0x195   :  { %v211_v44 = vpack.c.bf16 %v210_v42, %v210_v42 }
 0x196   :  { %v459_v45 = vpop.f32.mrf.mxu1 }
 0x197   :  { %353 = vmatmul.mubr.bf16.vlgmr.msra.gmra.mxu0 %v211_v44 }
 0x257   :  { %v354_v53 = vpop.f32.mrf.mxu0 }
 0x258   :  { %v355_v54 = vadd.f32 %v354_v53, %v233_v51 }
 0x259   :  { %v356_v55 = vpop.f32.mrf.mxu0 }
 0x25a   :  { %v418_v56 = vmul.f32 -1.442695, %v355_v54  ;;  %v357_v57 = vadd.f32 %v356_v55, %v237_v52 }
 0x25b   :  { %v358_v58 = vpop.f32.mrf.mxu0 }
 0x25c   :  { %498 = vpow2.f32 %v418_v56  ;;  %v419_v59 = vmul.f32 -1.442695, %v357_v57 }
 0x25d   :  { %v359_v60 = vpop.f32.mrf.mxu0 }
 0x25e   :  { %500 = vpow2.f32 %v419_v59 }
 0x269   :  { %v499_v61 = vpop.eup %498 }
 0x26a   :  { %v367_v62 = vadd.f32 1.0, %v499_v61 }
 0x26b   :  { %v501_v63 = vpop.eup %500 }
 0x26c   :  { %502 = vrcp.f32 %v367_v62  ;;  %v368_v0 = vadd.f32 1.0, %v501_v63 }
 0x26e   :  { %504 = vrcp.f32 %v368_v0 }
 0x279   :  { %v503_v1 = vpop.eup %502 }
 0x27a   :  { %373 = vst [vmem:[#allocation2] sm:$0xff] %v503_v1 }
 0x27b   :  { %v505_v2 = vpop.eup %504 }
 0x27c   :  { %374 = vst [vmem:[#allocation2 + $0x8] sm:$0xff] %v505_v2 }
 0x27d   :  { %517 = shalt.err (!%p514_p4)
}
 0x27e   :  { %384 = dma.vmem_to_hbm [thread:$0]  %s382_s6, 256, %s672_s7, [#allocation3]  }
 0x27f   :  { %526 = dma.done.wait [#allocation3], 256  }
 0x280   :  { %527 = vsyncadd [#allocation3], 4294967040 }
 0x281   :  { %388 = vsyncpa [#allocation3], 1 }

</bundles_post_ra>
